<compile_context>
chip_gen: v7x
topology: tpu7x:2x2x1
jax: 0.10.0
libtpu: 0.0.40
codegen_flags: <defaults>
</compile_context>

<pallas_src>
import math

import jax
import jax.numpy as jnp
from jax.experimental import pallas as pl
from jax.experimental.pallas import tpu as pltpu


_VMEM_LIMIT = 40 * 1024 * 1024   # scoped VMEM ceiling; safe on v7x (64 MiB physical)
_IO_BUDGET = 16 * 1024 * 1024    # budget for double-buffered in + out blocks
_TB_MAX = 8192                   # max rows per grid block
_CH_SMALL = 256                  # lane-chunk (rows) per in-kernel step, K <= 64
_CH_LARGE = 512                  # lane-chunk for the fori (large-K) path
_UNROLL_MAX_K = 64               # fully unroll the O(K^2) loop up to this K
_MAX_KERNEL_K = 1024             # beyond this, fall back to XLA (see TODO below)
_CONTRACT_LAST = (((1,), (1,)), ((), ()))   # dot_general: contract last dims (A . B^T)


def _round_up(v, m):
    return -(-v // m) * m


def _round_down(v, m):
    return (v // m) * m


def _eye_f32(n):
    """n x n identity built from 2-D iotas (cheap to materialize in-kernel)."""
    r = jax.lax.broadcasted_iota(jnp.int32, (n, n), 0)
    c = jax.lax.broadcasted_iota(jnp.int32, (n, n), 1)
    return (r == c).astype(jnp.float32)


def _sparsemax_ref_last_axis(x):
    """Pure-JAX reference (sort-based, mirrors the PyTorch SparsemaxFunction)."""
    z = x - jnp.max(x, axis=-1, keepdims=True)
    zs = jnp.flip(jnp.sort(z, axis=-1), axis=-1)              # descending
    K = z.shape[-1]
    rho = jnp.arange(1, K + 1, dtype=z.dtype)
    cs = jnp.cumsum(zs, axis=-1) - 1.0
    supp = rho * zs > cs
    k = jnp.sum(supp, axis=-1, keepdims=True)
    tau = jnp.take_along_axis(cs, k.astype(jnp.int32) - 1, axis=-1) / k.astype(z.dtype)
    return jnp.clip(z - tau, 0.0, None)


def _make_sparsemax_kernel(K, ch, n_chunks, unrolled):
    """Kernel over a (n_chunks*ch, K) row-major block; sparsemax along the K axis."""

    def _do_chunk(x_ref, o_ref, z_scr, eye_k, eye_c, off):
        if off is None:
            zt = x_ref[...].astype(jnp.float32)                    # (ch, K) row-major
        else:
            zt = x_ref[pl.ds(off, ch), :].astype(jnp.float32)
        # Row-major -> lane-dense via an identity matmul on the (idle) MXU:
        #   z[a, r] = sum_j eye_k[a, j] * zt[r, j] = zt[r, a]
        z = jax.lax.dot_general(eye_k, zt, _CONTRACT_LAST,
                                preferred_element_type=jnp.float32)  # (K, ch)
        z = z - jnp.max(z, axis=0, keepdims=True)                  # stability shift

        # Streamed O(K^2) support sum: acc[a, r] = sum_b relu(z[b, r] - z[a, r]).
        if unrolled:
            acc = jnp.zeros_like(z)
            for b in range(K):
                acc = acc + jnp.maximum(z[b:b + 1, :] - z, 0.0)
        else:
            z_scr[...] = z

            def body(b, a):
                zb = z_scr[pl.ds(b, 1), :]                         # (1, ch)
                return a + jnp.maximum(zb - z, 0.0)

            acc = jax.lax.fori_loop(0, K, body, jnp.zeros_like(z))

        supp = acc < 1.0                                           # a in support
        k = jnp.sum(supp.astype(jnp.float32), axis=0, keepdims=True)
        s = jnp.sum(jnp.where(supp, z, 0.0), axis=0, keepdims=True)
        tau = (s - 1.0) / k                                        # k >= 1 (argmax always in support)
        out_ld = jnp.maximum(z - tau, 0.0)                         # (K, ch) lane-dense, in [0, 1]
        # Kill NaN/Inf that can appear in ragged-block padding columns: the
        # transpose-back matmul contracts over columns, so one non-finite padded
        # column would otherwise poison every valid row of the chunk.
        out_ld = jnp.where(out_ld < 1e30, out_ld, 0.0)
        # Lane-dense -> row-major, again via an identity matmul on the MXU.
        out_rm = jax.lax.dot_general(eye_c, out_ld, _CONTRACT_LAST,
                                     preferred_element_type=jnp.float32)  # (ch, K)
        if off is None:
            o_ref[...] = out_rm.astype(o_ref.dtype)
        else:
            o_ref[pl.ds(off, ch), :] = out_rm.astype(o_ref.dtype)

    def kernel(x_ref, o_ref, *scratch):
        z_scr = scratch[0] if scratch else None
        eye_k = _eye_f32(K)          # hoisted: built once per grid step
        eye_c = _eye_f32(ch)
        if n_chunks == 1:
            _do_chunk(x_ref, o_ref, z_scr, eye_k, eye_c, None)
        else:
            @pl.loop(0, n_chunks)
            def _(c):
                _do_chunk(x_ref, o_ref, z_scr, eye_k, eye_c,
                          pl.multiple_of(c * ch, ch))

    return kernel


def sparsemax(x, dim=-1):
    """Sparsemax along `dim`; the whole hot path runs in a single Pallas kernel."""
    dim = dim % x.ndim
    xm = jnp.moveaxis(x, dim, -1)              # no copy when dim is already last
    lead_shape = xm.shape[:-1]
    K = xm.shape[-1]
    rows = math.prod(lead_shape) if lead_shape else 1
    x2 = xm.reshape(rows, K)

    if K > _MAX_KERNEL_K:
        # TODO(synk): Pallas bisection-on-tau kernel for very large K; the O(K^2)
        # support sum and the (K, K) identity stop being reasonable there.
        out2 = _sparsemax_ref_last_axis(x2.astype(jnp.float32)).astype(x.dtype)
    else:
        unrolled = K <= _UNROLL_MAX_K
        ch = _CH_SMALL if unrolled else _CH_LARGE
        if rows <= ch:
            ch = _round_up(rows, 8)            # single small block; padded rows are masked on writeback
            tb = ch
        else:
            # Rows per block bounded so the double-buffered in/out blocks stay
            # well inside VMEM on every chip (v7x has only 64 MiB per core).
            tb_cap = max(ch, _round_down(_IO_BUDGET // (4 * K * 4), ch))
            if rows >= 4 * ch:
                # >= 4 blocks when possible: both v7x TensorCores get work and each
                # core has >= 2 blocks so the HBM->VMEM DMA pipelines with compute.
                tb = min(_TB_MAX, tb_cap, _round_up(-(-rows // 4), ch))
            else:
                tb = ch
        n_chunks = tb // ch
        grid = (pl.cdiv(rows, tb),)

        scratch_shapes = [] if unrolled else [pltpu.VMEM((K, ch), jnp.float32)]
        out2 = pl.pallas_call(
            _make_sparsemax_kernel(K, ch, n_chunks, unrolled),
            out_shape=jax.ShapeDtypeStruct((rows, K), x.dtype),
            grid_spec=pltpu.PrefetchScalarGridSpec(
                num_scalar_prefetch=0,
                grid=grid,
                in_specs=[pl.BlockSpec((tb, K), lambda i: (i, 0))],
                out_specs=pl.BlockSpec((tb, K), lambda i: (i, 0)),
                scratch_shapes=scratch_shapes,
            ),
            compiler_params=pltpu.CompilerParams(
                dimension_semantics=("parallel",),
                vmem_limit_bytes=_VMEM_LIMIT,
            ),
        )(x2)

    out = out2.reshape(*lead_shape, K)
    return jnp.moveaxis(out, -1, dim)


if __name__ == "__main__":
    # Sparsemax has no parameters; dim=-1 is the module default.
    key = jax.random.PRNGKey(0)
    x = jax.random.normal(key, (2, 4, 16, 16), dtype=jnp.float32)  # NCHW-style input, K=16

    out = jax.block_until_ready(sparsemax(x, dim=-1))
    ref = _sparsemax_ref_last_axis(x)
    assert out.shape == x.shape and out.dtype == x.dtype
    assert jnp.allclose(out, ref, atol=1e-5, rtol=1e-5), "mismatch vs sort-based reference"
    assert jnp.allclose(jnp.sum(out, axis=-1), 1.0, atol=1e-4)
    assert jnp.all(out >= 0.0)

    # Non-default dim (exercises the moveaxis plumbing; K=4 unrolled path).
    out_d1 = jax.block_until_ready(sparsemax(x, dim=1))
    ref_d1 = jnp.moveaxis(_sparsemax_ref_last_axis(jnp.moveaxis(x, 1, -1)), -1, 1)
    assert jnp.allclose(out_d1, ref_d1, atol=1e-5, rtol=1e-5), "mismatch on dim=1"

    # Multi-chunk + ragged last block (exercises pl.loop path and padding sanitization).
    x_rag = jax.random.normal(jax.random.PRNGKey(2), (1152, 16), dtype=jnp.float32)
    out_rag = jax.block_until_ready(sparsemax(x_rag, dim=-1))
    ref_rag = _sparsemax_ref_last_axis(x_rag)
    assert jnp.allclose(out_rag, ref_rag, atol=1e-5, rtol=1e-5), "mismatch on ragged path"

    # Large-K path (fori_loop over b with VMEM scratch; K > 64).
    x_big = jax.random.normal(jax.random.PRNGKey(1), (32, 256), dtype=jnp.float32)
    out_big = jax.block_until_ready(sparsemax(x_big, dim=-1))
    ref_big = _sparsemax_ref_last_axis(x_big)
    assert jnp.allclose(out_big, ref_big, atol=1e-5, rtol=1e-5), "mismatch on large-K path"

    print("KERNEL_OK")
</pallas_src>

<mosaic_0001>
module attributes {stable_mosaic.version = 11 : i64} {
  func.func @kernel(%arg0: i32, %arg1: memref<128x16xf32, #tpu.memory_space<vmem>>, %arg2: memref<128x16xf32, #tpu.memory_space<vmem>>) attributes {dimension_semantics = [#tpu.dimension_semantics<parallel>], iteration_bounds = array<i64: 1>, scalar_prefetch = 0 : i64, scratch_operands = 0 : i64, tpu.core_type = #tpu.core_type<tc>, window_params = [{transform_indices = @transform_0, window_bounds = array<i64: 128, 16>}, {transform_indices = @transform_1, window_bounds = array<i64: 128, 16>}]} {
    %0 = tpu.iota {dimensions = array<i32: 0>} : vector<16x16xi32>
    %1 = tpu.iota {dimensions = array<i32: 1>} : vector<16x16xi32>
    %2 = arith.cmpi eq, %0, %1 : vector<16x16xi32>
    %3 = arith.extui %2 : vector<16x16xi1> to vector<16x16xi32>
    %4 = arith.sitofp %3 : vector<16x16xi32> to vector<16x16xf32>
    %5 = tpu.iota {dimensions = array<i32: 0>} : vector<128x128xi32>
    %6 = tpu.iota {dimensions = array<i32: 1>} : vector<128x128xi32>
    %7 = arith.cmpi eq, %5, %6 : vector<128x128xi32>
    %8 = arith.extui %7 : vector<128x128xi1> to vector<128x128xi32>
    %9 = arith.sitofp %8 : vector<128x128xi32> to vector<128x128xf32>
    %c0 = arith.constant 0 : index
    %c0_0 = arith.constant 0 : index
    %10 = vector.load %arg1[%c0, %c0_0] : memref<128x16xf32, #tpu.memory_space<vmem>>, vector<128x16xf32>
    %cst = arith.constant dense<0.000000e+00> : vector<16x128xf32>
    %11 = tpu.matmul %4, %10, %cst {dimension_numbers = #tpu.dot_dimension_numbers<[1], [1], [0], [0], [0, 0, 1, 0], [], []>} : vector<16x16xf32>, vector<128x16xf32>, vector<16x128xf32> -> vector<16x128xf32>
    %cst_1 = arith.constant dense<0xFF800000> : vector<128xf32>
    %12 = vector.multi_reduction <maximumf>, %11, %cst_1 [0] : vector<16x128xf32> to vector<128xf32>
    %13 = vector.shape_cast %12 : vector<128xf32> to vector<1x128xf32>
    %14 = vector.broadcast %13 : vector<1x128xf32> to vector<16x128xf32>
    %15 = arith.subf %11, %14 : vector<16x128xf32>
    %cst_2 = arith.constant 0.000000e+00 : f32
    %16 = vector.broadcast %cst_2 : f32 to vector<16x128xf32>
    %17 = vector.extract_strided_slice %15 {offsets = [0, 0], sizes = [1, 128], strides = [1, 1]} : vector<16x128xf32> to vector<1x128xf32>
    %18 = vector.broadcast %17 : vector<1x128xf32> to vector<16x128xf32>
    %19 = arith.subf %18, %15 : vector<16x128xf32>
    %cst_3 = arith.constant 0.000000e+00 : f32
    %20 = vector.broadcast %cst_3 : f32 to vector<16x128xf32>
    %21 = arith.maximumf %19, %20 : vector<16x128xf32>
    %22 = arith.addf %16, %21 : vector<16x128xf32>
    %23 = vector.extract_strided_slice %15 {offsets = [1, 0], sizes = [1, 128], strides = [1, 1]} : vector<16x128xf32> to vector<1x128xf32>
    %24 = vector.broadcast %23 : vector<1x128xf32> to vector<16x128xf32>
    %25 = arith.subf %24, %15 : vector<16x128xf32>
    %cst_4 = arith.constant 0.000000e+00 : f32
    %26 = vector.broadcast %cst_4 : f32 to vector<16x128xf32>
    %27 = arith.maximumf %25, %26 : vector<16x128xf32>
    %28 = arith.addf %22, %27 : vector<16x128xf32>
    %29 = vector.extract_strided_slice %15 {offsets = [2, 0], sizes = [1, 128], strides = [1, 1]} : vector<16x128xf32> to vector<1x128xf32>
    %30 = vector.broadcast %29 : vector<1x128xf32> to vector<16x128xf32>
    %31 = arith.subf %30, %15 : vector<16x128xf32>
    %cst_5 = arith.constant 0.000000e+00 : f32
    %32 = vector.broadcast %cst_5 : f32 to vector<16x128xf32>
    %33 = arith.maximumf %31, %32 : vector<16x128xf32>
    %34 = arith.addf %28, %33 : vector<16x128xf32>
    %35 = vector.extract_strided_slice %15 {offsets = [3, 0], sizes = [1, 128], strides = [1, 1]} : vector<16x128xf32> to vector<1x128xf32>
    %36 = vector.broadcast %35 : vector<1x128xf32> to vector<16x128xf32>
    %37 = arith.subf %36, %15 : vector<16x128xf32>
    %cst_6 = arith.constant 0.000000e+00 : f32
    %38 = vector.broadcast %cst_6 : f32 to vector<16x128xf32>
    %39 = arith.maximumf %37, %38 : vector<16x128xf32>
    %40 = arith.addf %34, %39 : vector<16x128xf32>
    %41 = vector.extract_strided_slice %15 {offsets = [4, 0], sizes = [1, 128], strides = [1, 1]} : vector<16x128xf32> to vector<1x128xf32>
    %42 = vector.broadcast %41 : vector<1x128xf32> to vector<16x128xf32>
    %43 = arith.subf %42, %15 : vector<16x128xf32>
    %cst_7 = arith.constant 0.000000e+00 : f32
    %44 = vector.broadcast %cst_7 : f32 to vector<16x128xf32>
    %45 = arith.maximumf %43, %44 : vector<16x128xf32>
    %46 = arith.addf %40, %45 : vector<16x128xf32>
    %47 = vector.extract_strided_slice %15 {offsets = [5, 0], sizes = [1, 128], strides = [1, 1]} : vector<16x128xf32> to vector<1x128xf32>
    %48 = vector.broadcast %47 : vector<1x128xf32> to vector<16x128xf32>
    %49 = arith.subf %48, %15 : vector<16x128xf32>
    %cst_8 = arith.constant 0.000000e+00 : f32
    %50 = vector.broadcast %cst_8 : f32 to vector<16x128xf32>
    %51 = arith.maximumf %49, %50 : vector<16x128xf32>
    %52 = arith.addf %46, %51 : vector<16x128xf32>
    %53 = vector.extract_strided_slice %15 {offsets = [6, 0], sizes = [1, 128], strides = [1, 1]} : vector<16x128xf32> to vector<1x128xf32>
    %54 = vector.broadcast %53 : vector<1x128xf32> to vector<16x128xf32>
    %55 = arith.subf %54, %15 : vector<16x128xf32>
    %cst_9 = arith.constant 0.000000e+00 : f32
    %56 = vector.broadcast %cst_9 : f32 to vector<16x128xf32>
    %57 = arith.maximumf %55, %56 : vector<16x128xf32>
    %58 = arith.addf %52, %57 : vector<16x128xf32>
    %59 = vector.extract_strided_slice %15 {offsets = [7, 0], sizes = [1, 128], strides = [1, 1]} : vector<16x128xf32> to vector<1x128xf32>
    %60 = vector.broadcast %59 : vector<1x128xf32> to vector<16x128xf32>
    %61 = arith.subf %60, %15 : vector<16x128xf32>
    %cst_10 = arith.constant 0.000000e+00 : f32
    %62 = vector.broadcast %cst_10 : f32 to vector<16x128xf32>
    %63 = arith.maximumf %61, %62 : vector<16x128xf32>
    %64 = arith.addf %58, %63 : vector<16x128xf32>
    %65 = vector.extract_strided_slice %15 {offsets = [8, 0], sizes = [1, 128], strides = [1, 1]} : vector<16x128xf32> to vector<1x128xf32>
    %66 = vector.broadcast %65 : vector<1x128xf32> to vector<16x128xf32>
    %67 = arith.subf %66, %15 : vector<16x128xf32>
    %cst_11 = arith.constant 0.000000e+00 : f32
    %68 = vector.broadcast %cst_11 : f32 to vector<16x128xf32>
    %69 = arith.maximumf %67, %68 : vector<16x128xf32>
    %70 = arith.addf %64, %69 : vector<16x128xf32>
    %71 = vector.extract_strided_slice %15 {offsets = [9, 0], sizes = [1, 128], strides = [1, 1]} : vector<16x128xf32> to vector<1x128xf32>
    %72 = vector.broadcast %71 : vector<1x128xf32> to vector<16x128xf32>
    %73 = arith.subf %72, %15 : vector<16x128xf32>
    %cst_12 = arith.constant 0.000000e+00 : f32
    %74 = vector.broadcast %cst_12 : f32 to vector<16x128xf32>
    %75 = arith.maximumf %73, %74 : vector<16x128xf32>
    %76 = arith.addf %70, %75 : vector<16x128xf32>
    %77 = vector.extract_strided_slice %15 {offsets = [10, 0], sizes = [1, 128], strides = [1, 1]} : vector<16x128xf32> to vector<1x128xf32>
    %78 = vector.broadcast %77 : vector<1x128xf32> to vector<16x128xf32>
    %79 = arith.subf %78, %15 : vector<16x128xf32>
    %cst_13 = arith.constant 0.000000e+00 : f32
    %80 = vector.broadcast %cst_13 : f32 to vector<16x128xf32>
    %81 = arith.maximumf %79, %80 : vector<16x128xf32>
    %82 = arith.addf %76, %81 : vector<16x128xf32>
    %83 = vector.extract_strided_slice %15 {offsets = [11, 0], sizes = [1, 128], strides = [1, 1]} : vector<16x128xf32> to vector<1x128xf32>
    %84 = vector.broadcast %83 : vector<1x128xf32> to vector<16x128xf32>
    %85 = arith.subf %84, %15 : vector<16x128xf32>
    %cst_14 = arith.constant 0.000000e+00 : f32
    %86 = vector.broadcast %cst_14 : f32 to vector<16x128xf32>
    %87 = arith.maximumf %85, %86 : vector<16x128xf32>
    %88 = arith.addf %82, %87 : vector<16x128xf32>
    %89 = vector.extract_strided_slice %15 {offsets = [12, 0], sizes = [1, 128], strides = [1, 1]} : vector<16x128xf32> to vector<1x128xf32>
    %90 = vector.broadcast %89 : vector<1x128xf32> to vector<16x128xf32>
    %91 = arith.subf %90, %15 : vector<16x128xf32>
    %cst_15 = arith.constant 0.000000e+00 : f32
    %92 = vector.broadcast %cst_15 : f32 to vector<16x128xf32>
    %93 = arith.maximumf %91, %92 : vector<16x128xf32>
    %94 = arith.addf %88, %93 : vector<16x128xf32>
    %95 = vector.extract_strided_slice %15 {offsets = [13, 0], sizes = [1, 128], strides = [1, 1]} : vector<16x128xf32> to vector<1x128xf32>
    %96 = vector.broadcast %95 : vector<1x128xf32> to vector<16x128xf32>
    %97 = arith.subf %96, %15 : vector<16x128xf32>
    %cst_16 = arith.constant 0.000000e+00 : f32
    %98 = vector.broadcast %cst_16 : f32 to vector<16x128xf32>
    %99 = arith.maximumf %97, %98 : vector<16x128xf32>
    %100 = arith.addf %94, %99 : vector<16x128xf32>
    %101 = vector.extract_strided_slice %15 {offsets = [14, 0], sizes = [1, 128], strides = [1, 1]} : vector<16x128xf32> to vector<1x128xf32>
    %102 = vector.broadcast %101 : vector<1x128xf32> to vector<16x128xf32>
    %103 = arith.subf %102, %15 : vector<16x128xf32>
    %cst_17 = arith.constant 0.000000e+00 : f32
    %104 = vector.broadcast %cst_17 : f32 to vector<16x128xf32>
    %105 = arith.maximumf %103, %104 : vector<16x128xf32>
    %106 = arith.addf %100, %105 : vector<16x128xf32>
    %107 = vector.extract_strided_slice %15 {offsets = [15, 0], sizes = [1, 128], strides = [1, 1]} : vector<16x128xf32> to vector<1x128xf32>
    %108 = vector.broadcast %107 : vector<1x128xf32> to vector<16x128xf32>
    %109 = arith.subf %108, %15 : vector<16x128xf32>
    %cst_18 = arith.constant 0.000000e+00 : f32
    %110 = vector.broadcast %cst_18 : f32 to vector<16x128xf32>
    %111 = arith.maximumf %109, %110 : vector<16x128xf32>
    %112 = arith.addf %106, %111 : vector<16x128xf32>
    %cst_19 = arith.constant 1.000000e+00 : f32
    %113 = vector.broadcast %cst_19 : f32 to vector<16x128xf32>
    %114 = arith.cmpf olt, %112, %113 : vector<16x128xf32>
    %115 = arith.extui %114 : vector<16x128xi1> to vector<16x128xi32>
    %116 = arith.sitofp %115 : vector<16x128xi32> to vector<16x128xf32>
    %cst_20 = arith.constant dense<0.000000e+00> : vector<128xf32>
    %117 = vector.multi_reduction <add>, %116, %cst_20 [0] : vector<16x128xf32> to vector<128xf32>
    %118 = vector.shape_cast %117 : vector<128xf32> to vector<1x128xf32>
    %cst_21 = arith.constant 0.000000e+00 : f32
    %119 = vector.broadcast %cst_21 : f32 to vector<16x128xf32>
    %120 = arith.select %114, %15, %119 : vector<16x128xi1>, vector<16x128xf32>
    %cst_22 = arith.constant dense<0.000000e+00> : vector<128xf32>
    %121 = vector.multi_reduction <add>, %120, %cst_22 [0] : vector<16x128xf32> to vector<128xf32>
    %122 = vector.shape_cast %121 : vector<128xf32> to vector<1x128xf32>
    %cst_23 = arith.constant 1.000000e+00 : f32
    %123 = vector.broadcast %cst_23 : f32 to vector<1x128xf32>
    %124 = arith.subf %122, %123 : vector<1x128xf32>
    %125 = arith.divf %124, %118 : vector<1x128xf32>
    %126 = vector.broadcast %125 : vector<1x128xf32> to vector<16x128xf32>
    %127 = arith.subf %15, %126 : vector<16x128xf32>
    %cst_24 = arith.constant 0.000000e+00 : f32
    %128 = vector.broadcast %cst_24 : f32 to vector<16x128xf32>
    %129 = arith.maximumf %127, %128 : vector<16x128xf32>
    %cst_25 = arith.constant 1.000000e+30 : f32
    %130 = vector.broadcast %cst_25 : f32 to vector<16x128xf32>
    %131 = arith.cmpf olt, %129, %130 : vector<16x128xf32>
    %cst_26 = arith.constant 0.000000e+00 : f32
    %132 = vector.broadcast %cst_26 : f32 to vector<16x128xf32>
    %133 = arith.select %131, %129, %132 : vector<16x128xi1>, vector<16x128xf32>
    %cst_27 = arith.constant dense<0.000000e+00> : vector<128x16xf32>
    %134 = tpu.matmul %9, %133, %cst_27 {dimension_numbers = #tpu.dot_dimension_numbers<[1], [1], [0], [0], [0, 0, 1, 0], [], []>} : vector<128x128xf32>, vector<16x128xf32>, vector<128x16xf32> -> vector<128x16xf32>
    %c0_28 = arith.constant 0 : index
    %c0_29 = arith.constant 0 : index
    %135 = vector.load %arg2[%c0_28, %c0_29] : memref<128x16xf32, #tpu.memory_space<vmem>>, vector<128x16xf32>
    tpu.vector_store %arg2[%c0_28, %c0_29], %134 {strides = array<i32>} : memref<128x16xf32, #tpu.memory_space<vmem>>, vector<128x16xf32>,
    return
  }
  func.func @transform_0(%arg0: i32) -> (i32, i32) {
    %c0_i32 = arith.constant 0 : i32
    %c0_i32_0 = arith.constant 0 : i32
    return %arg0, %c0_i32 : i32, i32
  }
  func.func @transform_1(%arg0: i32) -> (i32, i32) {
    %c0_i32 = arith.constant 0 : i32
    %c0_i32_0 = arith.constant 0 : i32
    return %arg0, %c0_i32 : i32, i32
  }
}

</mosaic_0001>

<bundles_post_ra>
// kernel: tpu_custom_call.1
= control target key start
LH: loop header
LB: loop body
LE: loop exit
PB: predicated region body
PF: predicated region fallthrough
CT: control target
= control target key end

     0   :  { %vm91_vm0 = vcmask 130048   ;;  %v8_v0 = vlaneseq  ;;  %v800_v10 = vmov 0.0   ;;  %v801_v32 = vmov 1.0   ;;  %s1115_s0 = inlined_call_operand.vmem [shape: f32[128,16], index: 0, kind: input, shape index: {}]   ;;  %s1116_s1 = inlined_call_operand.vmem [shape: f32[128,16], index: 1, kind: output, shape index: {}]  }
   0x1   :  { %v75_v1 = vld [vmem:[%s1115_s0] sm:$0xff]  ;;  %v76_v2 = vld [vmem:[%s1115_s0 + $0x8] sm:$0xff]  ;;  %vm820_vm1 = vmpackc.low %vm91_vm0, %vm91_vm0 }
   0x2   :  { %v742_v4 = vpack.c.bf16 %v76_v2, %v75_v1  ;;  %v77_v5 = vld [vmem:[%s1115_s0 + $0x10] sm:$0xff]  ;;  %v78_v6 = vld [vmem:[%s1115_s0 + $0x18] sm:$0xff]  ;;  %v830_v7 = vshrl.u32 %v8_v0, 7  ;;  %v832_v8 = vand.u32 127, %v8_v0  ;;  %v79_v12 = vld [vmem:[%s1115_s0 + $0x20] sm:$0xff] }
   0x3   :  { %v748_v9 = vpack.c.bf16 %v78_v6, %v77_v5  ;;  %v80_v13 = vld [vmem:[%s1115_s0 + $0x28] sm:$0xff]  ;;  %v81_v15 = vld [vmem:[%s1115_s0 + $0x30] sm:$0xff]  ;;  %v82_v16 = vld [vmem:[%s1115_s0 + $0x38] sm:$0xff] }
   0x4   :  { %744 = vmatprep.subr.msk.bf16.mxu0 %vm820_vm1, %v742_v4  ;;  %vm13_vm2 = vcmp.eq.s32.totalorder %v830_v7, %v832_v8  ;;  %v754_v14 = vpack.c.bf16 %v80_v13, %v79_v12  ;;  %v760_v17 = vpack.c.bf16 %v82_v16, %v81_v15  ;;  %v83_v18 = vld [vmem:[%s1115_s0 + $0x40] sm:$0xff]  ;;  %v84_v19 = vld [vmem:[%s1115_s0 + $0x48] sm:$0xff]  ;;  %v85_v21 = vld [vmem:[%s1115_s0 + $0x50] sm:$0xff]  ;;  %v908_v30 = vadd.s32 8, %v830_v7 }
   0x5   :  { %747 = vmatpush3.bf16.xpose.msk.msra.mxu0 %vm820_vm1, %v742_v4  ;;  %v588_v11 = vsel %vm13_vm2, 1.0, %v800_v10  ;;  %v766_v20 = vpack.c.bf16 %v84_v19, %v83_v18  ;;  %v86_v22 = vld [vmem:[%s1115_s0 + $0x58] sm:$0xff]  ;;  %v87_v24 = vld [vmem:[%s1115_s0 + $0x60] sm:$0xff]  ;;  %v88_v25 = vld [vmem:[%s1115_s0 + $0x68] sm:$0xff]  ;;  %718 = vmatprep.mubr.msk.f32.mxu1 %vm13_vm2, %v801_v32  ;;  %v232_v41 = vsub.s32 0, %v830_v7  ;;  %v242_v43 = vsub.s32 1, %v830_v7 }
   0x6   :  { %750 = vmatprep.subr.msk.bf16.mxu0 %vm820_vm1, %v748_v9  ;;  %711 = vmatprep.mubr.msk.f32.mxu0 %vm91_vm0, %v588_v11  ;;  %v772_v23 = vpack.c.bf16 %v86_v22, %v85_v21  ;;  %v778_v26 = vpack.c.bf16 %v88_v25, %v87_v24  ;;  %v89_v27 = vld [vmem:[%s1115_s0 + $0x70] sm:$0xff]  ;;  %v90_v28 = vld [vmem:[%s1115_s0 + $0x78] sm:$0xff]  ;;  %vm14_vm3 = vcmp.eq.s32.totalorder %v908_v30, %v832_v8  ;;  %v252_v44 = vsub.s32 2, %v830_v7 }
   0x7   :  { %v784_v29 = vpack.c.bf16 %v90_v28, %v89_v27  ;;  %v589_v31 = vsel %vm14_vm3, 1.0, %v800_v10  ;;  %v262_v45 = vsub.s32 3, %v830_v7  ;;  %v272_v46 = vsub.s32 4, %v830_v7 }
   0x8   :  { %v282_v47 = vsub.s32 5, %v830_v7  ;;  %v292_v56 = vsub.s32 6, %v830_v7  ;;  %v302_v57 = vsub.s32 7, %v830_v7  ;;  %v25_v30 = vadd.s32 64, %v830_v7 }
   0xa   :  { %vm39_vm15 = vcmp.eq.s32.totalorder %v25_v30, %v832_v8 }
   0xd   :  { %753 = vmatpush3.bf16.xpose.msk.msra.mxu0 %vm820_vm1, %v748_v9 }
   0xe   :  { %756 = vmatprep.subr.msk.bf16.mxu0 %vm820_vm1, %v754_v14 }
  0x15   :  { %759 = vmatpush3.bf16.xpose.msk.msra.mxu0 %vm820_vm1, %v754_v14 }
  0x16   :  { %762 = vmatprep.subr.msk.bf16.mxu0 %vm820_vm1, %v760_v17 }
  0x1d   :  { %765 = vmatpush3.bf16.xpose.msk.msra.mxu0 %vm820_vm1, %v760_v17 }
  0x1e   :  { %768 = vmatprep.subr.msk.bf16.mxu0 %vm820_vm1, %v766_v20 }
  0x25   :  { %771 = vmatpush3.bf16.xpose.msk.msra.mxu0 %vm820_vm1, %v766_v20 }
  0x26   :  { %774 = vmatprep.subr.msk.bf16.mxu0 %vm820_vm1, %v772_v23 }
  0x2d   :  { %777 = vmatpush3.bf16.xpose.msk.msra.mxu0 %vm820_vm1, %v772_v23 }
  0x2e   :  { %780 = vmatprep.subr.msk.bf16.mxu0 %vm820_vm1, %v778_v26 }
  0x35   :  { %783 = vmatpush3.bf16.xpose.msk.msra.mxu0 %vm820_vm1, %v778_v26 }
  0x36   :  { %786 = vmatprep.subr.msk.bf16.mxu0 %vm820_vm1, %v784_v29 }
  0x3d   :  { %789 = vmatpush3.bf16.xpose.msk.msra.mxu0 %vm820_vm1, %v784_v29 }
  0x44   :  { %712 = vmatmul.mubr.msk.f32.vlgmr.msra.gmra.mrb[0].mxu0 %vm91_vm0, %v589_v31 }
 0x117   :  { %v713_v33 = vpop.f32.mrb[0].mxu0 }
 0x118   :  { %v212_v34 = vpop.f32.mrb[1].mxu0 }
 0x119   :  { %v221_v35 = vmax.f32 %v212_v34, %v713_v33 }
 0x11b   :  { %v222_v36 = vrot.slane %v221_v35, 4 }
 0x11d   :  { %v223_v37 = vmax.f32 %v221_v35, %v222_v36 }
 0x11f   :  { %v224_v38 = vrot.slane %v223_v37, 2 }
 0x121   :  { %v225_v39 = vmax.f32 %v223_v37, %v224_v38 }
 0x123   :  { %v226_v40 = vrot.slane %v225_v39, 1 }
 0x125   :  { %v227_v42 = vmax.f32 %v225_v39, %v226_v40 }
 0x127   :  { %v929_v48 = vsub.f32 %v212_v34, %v227_v42  ;;  %v931_v49 = vsub.f32 %v713_v33, %v227_v42 }
 0x129   :  { %v233_v50 = vrot.slane %v929_v48, %v232_v41  ;;  %v243_v51 = vrot.slane %v929_v48, %v242_v43  ;;  %v253_v52 = vrot.slane %v929_v48, %v252_v44  ;;  %v263_v53 = vrot.slane %v929_v48, %v262_v45 }
 0x12a   :  { %v273_v54 = vrot.slane %v929_v48, %v272_v46  ;;  %v283_v55 = vrot.slane %v929_v48, %v282_v47  ;;  %v293_v11 = vrot.slane %v929_v48, %v292_v56  ;;  %v303_v18 = vrot.slane %v929_v48, %v302_v57 }
 0x12b   :  { %v234_v58 = vsub.f32 %v233_v50, %v929_v48  ;;  %v235_v59 = vsub.f32 %v233_v50, %v931_v49  ;;  %v244_v60 = vsub.f32 %v243_v51, %v929_v48  ;;  %v245_v61 = vsub.f32 %v243_v51, %v931_v49 }
 0x12c   :  { %v254_v62 = vsub.f32 %v253_v52, %v929_v48  ;;  %v255_v63 = vsub.f32 %v253_v52, %v931_v49  ;;  %v264_v0 = vsub.f32 %v263_v53, %v929_v48  ;;  %v265_v1 = vsub.f32 %v263_v53, %v931_v49 }
 0x12d   :  { %v236_v2 = vmax.f32 %v234_v58, 0.0  ;;  %v237_v3 = vmax.f32 %v235_v59, 0.0  ;;  %v246_v4 = vmax.f32 %v244_v60, 0.0  ;;  %v247_v5 = vmax.f32 %v245_v61, 0.0 }
 0x12e   :  { %v256_v6 = vmax.f32 %v254_v62, 0.0  ;;  %v257_v9 = vmax.f32 %v255_v63, 0.0  ;;  %v274_v14 = vsub.f32 %v273_v54, %v929_v48  ;;  %v275_v15 = vsub.f32 %v273_v54, %v931_v49 }
 0x12f   :  { %v248_v12 = vadd.f32 %v246_v4, %v236_v2  ;;  %v249_v13 = vadd.f32 %v247_v5, %v237_v3  ;;  %v284_v16 = vsub.f32 %v283_v55, %v929_v48  ;;  %v285_v17 = vsub.f32 %v283_v55, %v931_v49 }
 0x130   :  { %v266_v21 = vmax.f32 %v264_v0, 0.0  ;;  %v267_v22 = vmax.f32 %v265_v1, 0.0  ;;  %v294_v23 = vsub.f32 %v293_v11, %v929_v48  ;;  %v295_v24 = vsub.f32 %v293_v11, %v931_v49 }
 0x131   :  { %v258_v19 = vadd.f32 %v256_v6, %v248_v12  ;;  %v259_v20 = vadd.f32 %v257_v9, %v249_v13  ;;  %v276_v27 = vmax.f32 %v274_v14, 0.0  ;;  %v277_v28 = vmax.f32 %v275_v15, 0.0 }
 0x132   :  { %v286_v29 = vmax.f32 %v284_v16, 0.0  ;;  %v287_v31 = vmax.f32 %v285_v17, 0.0  ;;  %v313_v33 = vrot.slane %v931_v49, %v232_v41  ;;  %v323_v34 = vrot.slane %v931_v49, %v242_v43 }
 0x133   :  { %v268_v25 = vadd.f32 %v266_v21, %v258_v19  ;;  %v269_v26 = vadd.f32 %v267_v22, %v259_v20  ;;  %v304_v37 = vsub.f32 %v303_v18, %v929_v48  ;;  %v305_v38 = vsub.f32 %v303_v18, %v931_v49 }
 0x134   :  { %v296_v39 = vmax.f32 %v294_v23, 0.0  ;;  %v297_v40 = vmax.f32 %v295_v24, 0.0  ;;  %v333_v42 = vrot.slane %v931_v49, %v252_v44  ;;  %v314_v52 = vsub.f32 %v313_v33, %v929_v48 }
 0x135   :  { %v278_v35 = vadd.f32 %v276_v27, %v268_v25  ;;  %v279_v36 = vadd.f32 %v277_v28, %v269_v26  ;;  %v315_v53 = vsub.f32 %v313_v33, %v931_v49  ;;  %v324_v41 = vsub.f32 %v323_v34, %v929_v48 }
 0x136   :  { %v325_v43 = vsub.f32 %v323_v34, %v931_v49  ;;  %v343_v54 = vrot.slane %v931_v49, %v262_v45  ;;  %v306_v59 = vmax.f32 %v304_v37, 0.0  ;;  %v307_v60 = vmax.f32 %v305_v38, 0.0 }
 0x137   :  { %v288_v50 = vadd.f32 %v286_v29, %v278_v35  ;;  %v289_v51 = vadd.f32 %v287_v31, %v279_v36  ;;  %v334_v61 = vsub.f32 %v333_v42, %v929_v48  ;;  %v335_v44 = vsub.f32 %v333_v42, %v931_v49 }
 0x138   :  { %v353_v62 = vrot.slane %v931_v49, %v272_v46  ;;  %v316_v1 = vmax.f32 %v314_v52, 0.0  ;;  %v317_v2 = vmax.f32 %v315_v53, 0.0  ;;  %v326_v3 = vmax.f32 %v324_v41, 0.0 }
 0x139   :  { %v298_v55 = vadd.f32 %v296_v39, %v288_v50  ;;  %v299_v58 = vadd.f32 %v297_v40, %v289_v51  ;;  %v327_v4 = vmax.f32 %v325_v43, 0.0  ;;  %v363_v45 = vrot.slane %v931_v49, %v282_v47 }
 0x13a   :  { %v344_v9 = vsub.f32 %v343_v54, %v929_v48  ;;  %v345_v11 = vsub.f32 %v343_v54, %v931_v49  ;;  %v336_v12 = vmax.f32 %v334_v61, 0.0  ;;  %v354_v13 = vsub.f32 %v353_v62, %v929_v48 }
 0x13b   :  { %v308_v63 = vadd.f32 %v306_v59, %v298_v55  ;;  %v309_v0 = vadd.f32 %v307_v60, %v299_v58  ;;  %v355_v46 = vsub.f32 %v353_v62, %v931_v49  ;;  %v337_v16 = vmax.f32 %v335_v44, 0.0 }
 0x13c   :  { %v373_v17 = vrot.slane %v931_v49, %v292_v56  ;;  %v364_v47 = vsub.f32 %v363_v45, %v929_v48  ;;  %v365_v18 = vsub.f32 %v363_v45, %v931_v49  ;;  %v383_v19 = vrot.slane %v931_v49, %v302_v57 }
 0x13d   :  { %v318_v5 = vadd.f32 %v316_v1, %v308_v63  ;;  %v319_v6 = vadd.f32 %v317_v2, %v309_v0  ;;  %v346_v22 = vmax.f32 %v344_v9, 0.0  ;;  %v347_v23 = vmax.f32 %v345_v11, 0.0 }
 0x13e   :  { %v356_v24 = vmax.f32 %v354_v13, 0.0  ;;  %v357_v25 = vmax.f32 %v355_v46, 0.0  ;;  %v374_v28 = vsub.f32 %v373_v17, %v929_v48  ;;  %v375_v56 = vsub.f32 %v373_v17, %v931_v49 }
 0x13f   :  { %v328_v14 = vadd.f32 %v326_v3, %v318_v5  ;;  %v329_v15 = vadd.f32 %v327_v4, %v319_v6  ;;  %v366_v29 = vmax.f32 %v364_v47, 0.0  ;;  %v367_v31 = vmax.f32 %v365_v18, 0.0 }
 0x140   :  { %v384_v35 = vsub.f32 %v383_v19, %v929_v48  ;;  %v385_v57 = vsub.f32 %v383_v19, %v931_v49  ;;  %v376_v38 = vmax.f32 %v374_v28, 0.0  ;;  %v377_v39 = vmax.f32 %v375_v56, 0.0 }
 0x141   :  { %v338_v20 = vadd.f32 %v336_v12, %v328_v14  ;;  %v339_v21 = vadd.f32 %v337_v16, %v329_v15  ;;  %v19_v15 = vadd.s32 16, %v830_v7  ;;  %v20_v16 = vadd.s32 24, %v830_v7 }
 0x142   :  { %v386_v50 = vmax.f32 %v384_v35, 0.0  ;;  %v387_v51 = vmax.f32 %v385_v57, 0.0  ;;  %v21_v17 = vadd.s32 32, %v830_v7  ;;  %v24_v47 = vadd.s32 56, %v830_v7 }
 0x143   :  { %v348_v26 = vadd.f32 %v346_v22, %v338_v20  ;;  %v349_v27 = vadd.f32 %v347_v23, %v339_v21  ;;  %vm33_vm9 = vcmp.eq.s32.totalorder %v19_v15, %v832_v8  ;;  %vm34_vm10 = vcmp.eq.s32.totalorder %v20_v16, %v832_v8 }
 0x144   :  { %vm35_vm11 = vcmp.eq.s32.totalorder %v21_v17, %v832_v8  ;;  %vm38_vm14 = vcmp.eq.s32.totalorder %v24_v47, %v832_v8  ;;  %v26_v18 = vadd.s32 72, %v830_v7  ;;  %v27_v19 = vadd.s32 80, %v830_v7 }
 0x145   :  { %v358_v33 = vadd.f32 %v356_v24, %v348_v26  ;;  %v359_v34 = vadd.f32 %v357_v25, %v349_v27  ;;  %v28_v20 = vadd.s32 88, %v830_v7  ;;  %v29_v21 = vadd.s32 96, %v830_v7 }
 0x146   :  { %vm40_vm1 = vcmp.eq.s32.totalorder %v26_v18, %v832_v8  ;;  %vm41_vm2 = vcmp.eq.s32.totalorder %v27_v19, %v832_v8  ;;  %v30_v22 = vadd.s32 104, %v830_v7  ;;  %v31_v23 = vadd.s32 112, %v830_v7 }
 0x147   :  { %v368_v36 = vadd.f32 %v366_v29, %v358_v33  ;;  %v369_v37 = vadd.f32 %v367_v31, %v359_v34  ;;  %v32_v24 = vadd.s32 120, %v830_v7 }
 0x149   :  { %v378_v40 = vadd.f32 %v376_v38, %v368_v36  ;;  %v379_v42 = vadd.f32 %v377_v39, %v369_v37 }
 0x14b   :  { %v388_v52 = vadd.f32 %v386_v50, %v378_v40  ;;  %v389_v53 = vadd.f32 %v387_v51, %v379_v42 }
 0x14d   :  { %vm390_vm4 = vcmp.lt.f32.partialorder %v388_v52, 1.0  ;;  %vm391_vm5 = vcmp.lt.f32.partialorder %v389_v53, 1.0 }
 0x14e   :  { %v622_v41 = vsel %vm390_vm4, 1.0, %v800_v10  ;;  %v623_v43 = vsel %vm391_vm5, 1.0, %v800_v10  ;;  %v403_v54 = vsel %vm390_vm4, %v929_v48, 0.0  ;;  %v404_v55 = vsel %vm391_vm5, %v931_v49, 0.0 }
 0x14f   :  { %v396_v58 = vadd.f32 %v623_v43, %v622_v41  ;;  %v405_v59 = vadd.f32 %v404_v55, %v403_v54  ;;  %vm43_vm4 = vcmp.eq.s32.totalorder %v29_v21, %v832_v8  ;;  %vm44_vm5 = vcmp.eq.s32.totalorder %v30_v22, %v832_v8 }
 0x151   :  { %v397_v60 = vrot.slane %v396_v58, 4  ;;  %v406_v61 = vrot.slane %v405_v59, 4 }
 0x153   :  { %v398_v44 = vadd.f32 %v397_v60, %v396_v58  ;;  %v407_v62 = vadd.f32 %v406_v61, %v405_v59 }
 0x155   :  { %v399_v63 = vrot.slane %v398_v44, 2  ;;  %v408_v0 = vrot.slane %v407_v62, 2 }
 0x157   :  { %v400_v1 = vadd.f32 %v399_v63, %v398_v44  ;;  %v409_v3 = vadd.f32 %v408_v0, %v407_v62 }
 0x159   :  { %v401_v2 = vrot.slane %v400_v1, 1  ;;  %v410_v45 = vrot.slane %v409_v3, 1 }
 0x15b   :  { %v402_v4 = vadd.f32 %v401_v2, %v400_v1  ;;  %v411_v5 = vadd.f32 %v410_v45, %v409_v3 }
 0x15d   :  { %798 = vrcp.f32 %v402_v4  ;;  %v624_v10 = vadd.f32 -1.0, %v411_v5 }
 0x167   :  { %v799_v6 = vpop.eup %798 }
 0x168   :  { %v414_v9 = vmul.f32 %v799_v6, %v624_v10 }
 0x16a   :  { %v415_v11 = vsub.f32 %v929_v48, %v414_v9  ;;  %v416_v12 = vsub.f32 %v931_v49, %v414_v9  ;;  %v22_v48 = vadd.s32 40, %v830_v7  ;;  %v23_v49 = vadd.s32 48, %v830_v7 }
 0x16c   :  { %v417_v13 = vmax.f32 %v415_v11, 0.0  ;;  %v418_v46 = vmax.f32 %v416_v12, 0.0  ;;  %vm36_vm12 = vcmp.eq.s32.totalorder %v22_v48, %v832_v8  ;;  %vm37_vm13 = vcmp.eq.s32.totalorder %v23_v49, %v832_v8 }
 0x16e   :  { %vm419_vm6 = vcmp.lt.f32.partialorder %v417_v13, 1e+30  ;;  %vm420_vm7 = vcmp.lt.f32.partialorder %v418_v46, 1e+30  ;;  %v790_v14 = vpack.c.bf16 %v418_v46, %v417_v13 }
 0x16f   :  { %vm791_vm8 = vmpackc.low %vm420_vm7, %vm419_vm6  ;;  %vm45_vm6 = vcmp.eq.s32.totalorder %v31_v23, %v832_v8  ;;  %vm46_vm7 = vcmp.eq.s32.totalorder %v32_v24, %v832_v8 }
 0x170   :  { %792 = vmatprep.subr.msk.bf16.mxu1 %vm791_vm8, %v790_v14 }
 0x171   :  { %795 = vmatpush3.bf16.xpose.msk.msra.mxu1 %vm791_vm8, %v790_v14 }
 0x178   :  { %719 = vmatmul.mubr.msk.f32.vlgmr.msra.gmra.mrb[0].mxu1 %vm14_vm3, %v801_v32  ;;  %vm42_vm3 = vcmp.eq.s32.totalorder %v28_v20, %v832_v8 }
 0x179   :  { %721 = vmatprep.mubr.msk.f32.mxu1 %vm33_vm9, %v801_v32 }
 0x17c   :  { %722 = vmatmul.mubr.msk.f32.gmra.mrb[2].mxu1 %vm34_vm10, %v801_v32 }
 0x17d   :  { %724 = vmatprep.mubr.msk.f32.mxu1 %vm35_vm11, %v801_v32 }
 0x180   :  { %725 = vmatmul.mubr.msk.f32.gmra.mrb[4].mxu1 %vm36_vm12, %v801_v32 }
 0x181   :  { %727 = vmatprep.mubr.msk.f32.mxu1 %vm37_vm13, %v801_v32 }
 0x184   :  { %728 = vmatmul.mubr.msk.f32.gmra.mrb[6].mxu1 %vm38_vm14, %v801_v32 }
 0x185   :  { %730 = vmatprep.mubr.msk.f32.mxu1 %vm39_vm15, %v801_v32 }
 0x188   :  { %731 = vmatmul.mubr.msk.f32.gmra.mrb[8].mxu1 %vm40_vm1, %v801_v32 }
 0x189   :  { %733 = vmatprep.mubr.msk.f32.mxu1 %vm41_vm2, %v801_v32 }
 0x18c   :  { %734 = vmatmul.mubr.msk.f32.gmra.mrb[10].mxu1 %vm42_vm3, %v801_v32 }
 0x18d   :  { %736 = vmatprep.mubr.msk.f32.mxu1 %vm43_vm4, %v801_v32 }
 0x190   :  { %737 = vmatmul.mubr.msk.f32.gmra.mrb[12].mxu1 %vm44_vm5, %v801_v32 }
 0x191   :  { %739 = vmatprep.mubr.msk.f32.mxu1 %vm45_vm6, %v801_v32 }
 0x194   :  { %740 = vmatmul.mubr.msk.f32.gmra.mrb[14].mxu1 %vm46_vm7, %v801_v32 }
 0x24b   :  { %v720_v25 = vpop.f32.mrb[0].mxu1 }
 0x24c   :  { %569 = vst.msk [vmem:[%s1116_s1 + $0x8] sm:$0xff] %vm91_vm0, %v720_v25  ;;  %v489_v26 = vpop.f32.mrb[1].mxu1 }
 0x24d   :  { %568 = vst.msk [vmem:[%s1116_s1] sm:$0xff] %vm91_vm0, %v489_v26 }
 0x24f   :  { %v723_v7 = vpop.f32.mrb[2].mxu1 }
 0x250   :  { %571 = vst.msk [vmem:[%s1116_s1 + $0x18] sm:$0xff] %vm91_vm0, %v723_v7  ;;  %v499_v8 = vpop.f32.mrb[3].mxu1 }
 0x251   :  { %570 = vst.msk [vmem:[%s1116_s1 + $0x10] sm:$0xff] %vm91_vm0, %v499_v8 }
 0x253   :  { %v726_v32 = vpop.f32.mrb[4].mxu1 }
 0x254   :  { %573 = vst.msk [vmem:[%s1116_s1 + $0x28] sm:$0xff] %vm91_vm0, %v726_v32  ;;  %v509_v27 = vpop.f32.mrb[5].mxu1 }
 0x255   :  { %572 = vst.msk [vmem:[%s1116_s1 + $0x20] sm:$0xff] %vm91_vm0, %v509_v27 }
 0x257   :  { %v729_v28 = vpop.f32.mrb[6].mxu1 }
 0x258   :  { %575 = vst.msk [vmem:[%s1116_s1 + $0x38] sm:$0xff] %vm91_vm0, %v729_v28  ;;  %v519_v56 = vpop.f32.mrb[7].mxu1 }
 0x259   :  { %574 = vst.msk [vmem:[%s1116_s1 + $0x30] sm:$0xff] %vm91_vm0, %v519_v56 }
 0x25b   :  { %v732_v29 = vpop.f32.mrb[8].mxu1 }
 0x25c   :  { %577 = vst.msk [vmem:[%s1116_s1 + $0x48] sm:$0xff] %vm91_vm0, %v732_v29  ;;  %v529_v31 = vpop.f32.mrb[9].mxu1 }
 0x25d   :  { %576 = vst.msk [vmem:[%s1116_s1 + $0x40] sm:$0xff] %vm91_vm0, %v529_v31 }
 0x25f   :  { %v735_v33 = vpop.f32.mrb[10].mxu1 }
 0x260   :  { %579 = vst.msk [vmem:[%s1116_s1 + $0x58] sm:$0xff] %vm91_vm0, %v735_v33  ;;  %v539_v34 = vpop.f32.mrb[11].mxu1 }
 0x261   :  { %578 = vst.msk [vmem:[%s1116_s1 + $0x50] sm:$0xff] %vm91_vm0, %v539_v34 }
 0x263   :  { %v738_v35 = vpop.f32.mrb[12].mxu1 }
 0x264   :  { %581 = vst.msk [vmem:[%s1116_s1 + $0x68] sm:$0xff] %vm91_vm0, %v738_v35  ;;  %v549_v57 = vpop.f32.mrb[13].mxu1 }
 0x265   :  { %580 = vst.msk [vmem:[%s1116_s1 + $0x60] sm:$0xff] %vm91_vm0, %v549_v57 }
 0x267   :  { %v741_v36 = vpop.f32.mrb[14].mxu1 }
 0x268   :  { %583 = vst.msk [vmem:[%s1116_s1 + $0x78] sm:$0xff] %vm91_vm0, %v741_v36  ;;  %v559_v37 = vpop.f32.mrb[15].mxu1 }
 0x269   :  { %582 = vst.msk [vmem:[%s1116_s1 + $0x70] sm:$0xff] %vm91_vm0, %v559_v37 }

</bundles_post_ra>
